<compile_context>
chip_gen: v5e
topology: v5e:2x2
jax: 0.10.0
libtpu: 0.0.40
codegen_flags: <defaults>
</compile_context>

<pallas_src>
import math

import jax
import jax.numpy as jnp
from jax.experimental import pallas as pl
from jax.experimental.pallas import tpu as pltpu


def _make_head_kernel(scope):
    """Builds the fused 1x1-conv + sigmoid + affine kernel (scope is static)."""

    def _head_kernel(x_ref, w_ref, b_ref, score_ref, geo_ref):
        # x_ref: (32, tm) channels-first pixel tile
        # w_ref: (6, 32) fused conv weights, b_ref: (6, 1) fused bias
        # score_ref: (1, tm), geo_ref: (5, tm)  -- lane-dense output tiles
        y = jnp.dot(w_ref[...], x_ref[...], preferred_element_type=jnp.float32)
        s = jax.nn.sigmoid(y + b_ref[...])          # (6, tm)

        # Row 0: score = s.
        score_ref[...] = s[0:1, :].astype(score_ref.dtype)

        # Rows 1-4: loc = s * scope ; row 5: angle = (s - 0.5) * pi.
        # Per-row scale/offset kept as (5, 1) constants; broadcast does the rest.
        row = jax.lax.broadcasted_iota(jnp.int32, (5, 1), 0)
        scale = jnp.where(row == 4, math.pi, scope).astype(jnp.float32)
        offset = jnp.where(row == 4, -0.5 * math.pi, 0.0).astype(jnp.float32)
        geo_ref[...] = (s[1:6, :] * scale + offset).astype(geo_ref.dtype)

    return _head_kernel


def east_output_head(x_nchw, w_cat, b_cat, *, scope=512.0, tm=16384):
    """x_nchw: [N, 32, H, W]. Returns (score [N,1,H,W], geo [N,5,H,W]) in f32."""
    N, C, H, W = x_nchw.shape
    assert C == 32
    Cout = w_cat.shape[0]  # 6
    HW = H * W

    # Channels-first flattened spatial axis (zero-copy reshape, no transpose).
    x = x_nchw.reshape(N, C, HW)
    # Allow bf16 feature maps without a mixed-dtype dot.
    w = w_cat.astype(x.dtype)
    b = b_cat.astype(jnp.float32)

    # Spatial tile: multiple of 128 lanes, no larger than the spatial extent
    # (rounded down to 128 when possible).  No padding of x — the last block
    # may be ragged; Pallas masks the out-of-bounds writeback.
    tm_eff = min(int(tm), max(128, (HW // 128) * 128))
    # v7x has 2 TensorCores: make sure the parallel grid has >= 2 steps.
    if N * pl.cdiv(HW, tm_eff) < 2 and tm_eff > 128:
        tm_eff = max(128, ((tm_eff // 2) // 128) * 128)

    grid = (N, pl.cdiv(HW, tm_eff))
    kernel = _make_head_kernel(float(scope))

    cost = pl.CostEstimate(
        flops=2 * N * Cout * C * HW,
        transcendentals=N * Cout * HW,
        bytes_accessed=N * HW * (C * x.dtype.itemsize + Cout * 4),
    )

    score_flat, geo_flat = pl.pallas_call(
        kernel,
        out_shape=(
            jax.ShapeDtypeStruct((N, 1, HW), jnp.float32),
            jax.ShapeDtypeStruct((N, Cout - 1, HW), jnp.float32),
        ),
        grid_spec=pltpu.PrefetchScalarGridSpec(
            num_scalar_prefetch=0,
            grid=grid,
            in_specs=[
                pl.BlockSpec((None, C, tm_eff), lambda n, j: (n, 0, j)),
                pl.BlockSpec((Cout, C), lambda n, j: (0, 0)),
                pl.BlockSpec((Cout, 1), lambda n, j: (0, 0)),
            ],
            out_specs=(
                pl.BlockSpec((None, 1, tm_eff), lambda n, j: (n, 0, j)),
                pl.BlockSpec((None, Cout - 1, tm_eff), lambda n, j: (n, 0, j)),
            ),
        ),
        compiler_params=pltpu.CompilerParams(
            dimension_semantics=("parallel", "parallel"),
            vmem_limit_bytes=32 * 1024 * 1024,
        ),
        cost_estimate=cost,
    )(x, w, b)

    # Zero-copy reshapes back to NCHW.
    score = score_flat.reshape(N, 1, H, W)
    geo = geo_flat.reshape(N, Cout - 1, H, W)
    return score, geo


def init_params(key):
    """kaiming_normal_(mode='fan_out', nonlinearity='relu') init, zero bias.

    For a 1x1 conv with out_channels o: fan_out = o, std = sqrt(2 / o).
    Weights returned already fused as [Cout=6, Cin=32] (conv1, conv2, conv3).
    """
    k1, k2, k3 = jax.random.split(key, 3)
    w1 = jax.random.normal(k1, (1, 32), jnp.float32) * math.sqrt(2.0 / 1.0)
    w2 = jax.random.normal(k2, (4, 32), jnp.float32) * math.sqrt(2.0 / 4.0)
    w3 = jax.random.normal(k3, (1, 32), jnp.float32) * math.sqrt(2.0 / 1.0)
    w_cat = jnp.concatenate([w1, w2, w3], axis=0)   # [6, 32]
    b_cat = jnp.zeros((6, 1), jnp.float32)
    return w_cat, b_cat


def _reference_head(x, w_cat, b_cat, scope=512.0):
    y = jnp.einsum('oc,nchw->nohw', w_cat, x) + b_cat.reshape(1, 6, 1, 1)
    s = jax.nn.sigmoid(y)
    score = s[:, :1]
    geo = jnp.concatenate([s[:, 1:5] * scope, (s[:, 5:] - 0.5) * math.pi], axis=1)
    return score, geo


if __name__ == "__main__":
    key = jax.random.PRNGKey(0)
    kx, kp = jax.random.split(key)
    w_cat, b_cat = init_params(kp)

    # Case 1: spatial extent a multiple of the 128-lane tile (N=2, 32, 16, 16).
    x1 = jax.random.normal(kx, (2, 32, 16, 16), jnp.float32)
    score1, geo1 = east_output_head(x1, w_cat, b_cat)
    jax.block_until_ready(score1)
    jax.block_until_ready(geo1)
    ref_s1, ref_g1 = _reference_head(x1, w_cat, b_cat)
    assert score1.shape == (2, 1, 16, 16) and geo1.shape == (2, 5, 16, 16)
    assert jnp.allclose(score1, ref_s1, atol=1e-5, rtol=1e-5)
    assert jnp.allclose(geo1, ref_g1, atol=1e-4, rtol=1e-5)

    # Case 2: ragged spatial extent (H=W=12 -> HW=144, not a multiple of 128)
    # to exercise the unpadded / masked-writeback path.
    x2 = jax.random.normal(kx, (2, 32, 12, 12), jnp.float32)
    score2, geo2 = east_output_head(x2, w_cat, b_cat)
    jax.block_until_ready(score2)
    jax.block_until_ready(geo2)
    ref_s2, ref_g2 = _reference_head(x2, w_cat, b_cat)
    assert score2.shape == (2, 1, 12, 12) and geo2.shape == (2, 5, 12, 12)
    assert jnp.allclose(score2, ref_s2, atol=1e-5, rtol=1e-5)
    assert jnp.allclose(geo2, ref_g2, atol=1e-4, rtol=1e-5)

    print("KERNEL_OK")
</pallas_src>

<mosaic_0001>
module attributes {stable_mosaic.version = 11 : i64} {
  func.func @_head_kernel(%arg0: i32, %arg1: i32, %arg2: memref<1x32x256xf32, #tpu.memory_space<vmem>>, %arg3: memref<6x32xf32, #tpu.memory_space<vmem>>, %arg4: memref<6x1xf32, #tpu.memory_space<vmem>>, %arg5: memref<1x1x256xf32, #tpu.memory_space<vmem>>, %arg6: memref<1x5x256xf32, #tpu.memory_space<vmem>>) attributes {dimension_semantics = [#tpu.dimension_semantics<parallel>, #tpu.dimension_semantics<parallel>], iteration_bounds = array<i64: 2, 1>, scalar_prefetch = 0 : i64, scratch_operands = 0 : i64, tpu.core_type = #tpu.core_type<tc>, window_params = [{transform_indices = @transform_0, window_bounds = array<i64: 1, 32, 256>}, {pipeline_mode = #tpu.pipeline_mode<synchronous>, transform_indices = @transform_1, window_bounds = array<i64: 6, 32>}, {pipeline_mode = #tpu.pipeline_mode<synchronous>, transform_indices = @transform_2, window_bounds = array<i64: 6, 1>}, {transform_indices = @transform_3, window_bounds = array<i64: 1, 1, 256>}, {transform_indices = @transform_4, window_bounds = array<i64: 1, 5, 256>}]} {
    %c0 = arith.constant 0 : index
    %c0_0 = arith.constant 0 : index
    %0 = vector.load %arg3[%c0, %c0_0] : memref<6x32xf32, #tpu.memory_space<vmem>>, vector<6x32xf32>
    %c0_1 = arith.constant 0 : index
    %c0_2 = arith.constant 0 : index
    %c0_3 = arith.constant 0 : index
    %1 = vector.load %arg2[%c0_1, %c0_2, %c0_3] : memref<1x32x256xf32, #tpu.memory_space<vmem>>, vector<1x32x256xf32>
    %2 = vector.shape_cast %1 : vector<1x32x256xf32> to vector<32x256xf32>
    %cst = arith.constant dense<0.000000e+00> : vector<6x256xf32>
    %3 = tpu.matmul %0, %2, %cst {dimension_numbers = #tpu.dot_dimension_numbers<[1], [0], [0], [1], [0, 0, 1, 1], [], []>} : vector<6x32xf32>, vector<32x256xf32>, vector<6x256xf32> -> vector<6x256xf32>
    %c0_4 = arith.constant 0 : index
    %c0_5 = arith.constant 0 : index
    %4 = vector.load %arg4[%c0_4, %c0_5] : memref<6x1xf32, #tpu.memory_space<vmem>>, vector<6x1xf32>
    %5 = vector.broadcast %4 : vector<6x1xf32> to vector<6x256xf32>
    %6 = arith.addf %3, %5 : vector<6x256xf32>
    %7 = arith.negf %6 : vector<6x256xf32>
    %8 = math.exp %7 : vector<6x256xf32>
    %cst_6 = arith.constant 1.000000e+00 : f32
    %9 = vector.broadcast %cst_6 : f32 to vector<6x256xf32>
    %10 = arith.addf %9, %8 : vector<6x256xf32>
    %11 = arith.divf %9, %10 : vector<6x256xf32>
    %12 = vector.extract_strided_slice %11 {offsets = [0, 0], sizes = [1, 256], strides = [1, 1]} : vector<6x256xf32> to vector<1x256xf32>
    %c0_7 = arith.constant 0 : index
    %c0_8 = arith.constant 0 : index
    %c0_9 = arith.constant 0 : index
    %13 = vector.load %arg5[%c0_7, %c0_8, %c0_9] : memref<1x1x256xf32, #tpu.memory_space<vmem>>, vector<1x1x256xf32>
    %14 = vector.shape_cast %13 : vector<1x1x256xf32> to vector<1x256xf32>
    %15 = vector.shape_cast %12 : vector<1x256xf32> to vector<1x1x256xf32>
    tpu.vector_store %arg5[%c0_7, %c0_8, %c0_9], %15 {strides = array<i32>} : memref<1x1x256xf32, #tpu.memory_space<vmem>>, vector<1x1x256xf32>,
    %16 = tpu.iota {dimensions = array<i32: 0>} : vector<5x1xi32>
    %c4_i32 = arith.constant 4 : i32
    %17 = vector.broadcast %c4_i32 : i32 to vector<5x1xi32>
    %18 = arith.cmpi eq, %16, %17 : vector<5x1xi32>
    %cst_10 = arith.constant 3.14159274 : f32
    %cst_11 = arith.constant 5.120000e+02 : f32
    %19 = vector.broadcast %cst_10 : f32 to vector<5x1xf32>
    %20 = vector.broadcast %cst_11 : f32 to vector<5x1xf32>
    %21 = arith.select %18, %19, %20 : vector<5x1xi1>, vector<5x1xf32>
    %c4_i32_12 = arith.constant 4 : i32
    %22 = vector.broadcast %c4_i32_12 : i32 to vector<5x1xi32>
    %23 = arith.cmpi eq, %16, %22 : vector<5x1xi32>
    %cst_13 = arith.constant -1.57079637 : f32
    %cst_14 = arith.constant 0.000000e+00 : f32
    %24 = vector.broadcast %cst_13 : f32 to vector<5x1xf32>
    %25 = vector.broadcast %cst_14 : f32 to vector<5x1xf32>
    %26 = arith.select %23, %24, %25 : vector<5x1xi1>, vector<5x1xf32>
    %27 = vector.extract_strided_slice %11 {offsets = [1, 0], sizes = [5, 256], strides = [1, 1]} : vector<6x256xf32> to vector<5x256xf32>
    %28 = vector.broadcast %21 : vector<5x1xf32> to vector<5x256xf32>
    %29 = arith.mulf %27, %28 : vector<5x256xf32>
    %30 = vector.broadcast %26 : vector<5x1xf32> to vector<5x256xf32>
    %31 = arith.addf %29, %30 : vector<5x256xf32>
    %c0_15 = arith.constant 0 : index
    %c0_16 = arith.constant 0 : index
    %c0_17 = arith.constant 0 : index
    %32 = vector.load %arg6[%c0_15, %c0_16, %c0_17] : memref<1x5x256xf32, #tpu.memory_space<vmem>>, vector<1x5x256xf32>
    %33 = vector.shape_cast %32 : vector<1x5x256xf32> to vector<5x256xf32>
    %34 = vector.shape_cast %31 : vector<5x256xf32> to vector<1x5x256xf32>
    tpu.vector_store %arg6[%c0_15, %c0_16, %c0_17], %34 {strides = array<i32>} : memref<1x5x256xf32, #tpu.memory_space<vmem>>, vector<1x5x256xf32>,
    return
  }
  func.func @transform_0(%arg0: i32, %arg1: i32) -> (i32, i32, i32) {
    %c0_i32 = arith.constant 0 : i32
    %c0_i32_0 = arith.constant 0 : i32
    return %arg0, %c0_i32, %arg1 : i32, i32, i32
  }
  func.func @transform_1(%arg0: i32, %arg1: i32) -> (i32, i32) {
    %c0_i32 = arith.constant 0 : i32
    %c0_i32_0 = arith.constant 0 : i32
    %c0_i32_1 = arith.constant 0 : i32
    return %c0_i32, %c0_i32_0 : i32, i32
  }
  func.func @transform_2(%arg0: i32, %arg1: i32) -> (i32, i32) {
    %c0_i32 = arith.constant 0 : i32
    %c0_i32_0 = arith.constant 0 : i32
    %c0_i32_1 = arith.constant 0 : i32
    return %c0_i32, %c0_i32_0 : i32, i32
  }
  func.func @transform_3(%arg0: i32, %arg1: i32) -> (i32, i32, i32) {
    %c0_i32 = arith.constant 0 : i32
    %c0_i32_0 = arith.constant 0 : i32
    return %arg0, %c0_i32, %arg1 : i32, i32, i32
  }
  func.func @transform_4(%arg0: i32, %arg1: i32) -> (i32, i32, i32) {
    %c0_i32 = arith.constant 0 : i32
    %c0_i32_0 = arith.constant 0 : i32
    return %arg0, %c0_i32, %arg1 : i32, i32, i32
  }
}

</mosaic_0001>

<bundles_post_ra>
// kernel: tpu_custom_call.1
= control target key start
LH: loop header
LB: loop body
LE: loop exit
PB: predicated region body
PF: predicated region fallthrough
CT: control target
= control target key end

     0   :  { %10 = vsyncpa [#allocation3], 0  ;;  %s926_s0 = inlined_call_operand.hbm [shape: f32[2,32,256], index: 0, kind: input, shape index: {}]   ;;  %s927_s1 = inlined_call_operand.vmem [shape: f32[6,32], index: 1, kind: input, shape index: {}]   ;;  %s928_s2 = inlined_call_operand.vmem [shape: f32[6,1], index: 2, kind: input, shape index: {}]   ;;  %s929_s3 = inlined_call_operand.hbm [shape: f32[2,1,256], index: 3, kind: output, shape index: {0}]   ;;  %s930_s4 = inlined_call_operand.vmem [shape: f32[2,5,256], index: 4, kind: output, shape index: {1}]  }
   0x1   :  { %12 = vsyncpa [#allocation3 + $0x1], 0 }
   0x2   :  { %13 = vsyncpa [#allocation4], 0 }
   0x3   :  { %15 = vsyncpa [#allocation4 + $0x1], 0  ;;  %s786_s15 = smov 0   ;;  %s788_s16 = smov 0  }
   0x4   :  { %s790_s17 = smov 0   ;;  %s792_s18 = smov 0  }
   0x5   :  { %s794_s19 = smov 0   ;;  %s796_s20 = smov 0  }
   0x6 LB: > { %s544_s21 = sadd.s32 4294967295, %s754_s20   ;;  %s545_s22 = sadd.s32 4294967294, %s754_s20   ;;  %s754_s20 = sphi %s796_s20, %s21_s20   ;;  %s750_s19 = sphi %s794_s19, %s939_s19   ;;  %s746_s18 = sphi %s792_s18, %s938_s18   ;;  %s742_s17 = sphi %s790_s17, %s937_s17   ;;  %s738_s16 = sphi %s788_s16, %s936_s16   ;;  %s734_s15 = sphi %s786_s15, %s935_s15  }
   0x7   : > { %s33_s23 = sadd.s32 1, %s750_s19  ;;  %s42_s24 = sadd.s32 1, %s742_s17 }
   0x8   : > { %p35_p0 = scmp.ge.s32.totalorder %s33_s23, 2  ;;  %p49_p1 = scmp.ne.s32.totalorder %s742_s17, %s738_s16 }
   0x9   : > { %p50_p2 = scmp.eq.s32.totalorder %s754_s20, 0  ;;  %p55_p3 = scmp.ne.s32.totalorder %s738_s16, %s734_s15 }
   0xa   : > { %s941_s23 = smov (%p35_p0, %s33_s23), 0  ;;  %p56_p5 = scmp.eq.s32.totalorder %s544_s21, 0 }
   0xb   : > { %p827_p4 = por %p50_p2, %p49_p1  ;;  %s37_s26 = ssub.s32 %s750_s19, %s941_s23 }
   0xc   : > { %p123_p6 = scmp.eq.s32.totalorder %s544_s21, 1  ;;  %p40_p7 = scmp.eq.s32.totalorder %s37_s26, 0 }
   0xd   : > { %p833_p8 = por %p56_p5, %p55_p3  ;;  %p129_p10 = scmp.eq.s32.totalorder %s545_s22, 1 }
   0xe   : > { %p837_p9 = por %p123_p6, %p49_p1  ;;  %p547_p12 = scmp.ge.s32.totalorder %s754_s20, 2 }
   0xf   : > { %s842_s29 = scalar_select %p40_p7, %s742_s17, %s42_s24  }
  0x10   : > { %p844_p11 = por %p129_p10, %p55_p3  ;;  %p578_p13 = scmp.lt.s32.totalorder %s754_s20, 2 }
  0x11   : > { %s183_s5 = sand.u32 1, %s742_s17   ;;  %s564_s7 = sshll.u32 %s750_s19, 6 }
  0x12   : > { %s548_s6 = sshll.u32 %s183_s5, 6  ;;  %s194_s10 = scalar_lea.hbm %s926_s0, %s564_s7 }
  0x13   : > { %s187_s11 = scalar_lea.vmem [#allocation2], %s548_s6  ;;  %s195_s13 = sshll.u32 %s194_s10, 4  ;;  %s196_s13 = int_to_ptr.hbm [resolvable:$true] %s195_s13 }
  0x14   : > { %s197_s12 = sshll.u32 %s187_s11, 4  ;;  %p571_p0 = pnand %p578_p13, %p827_p4  ;;  %s198_s12 = int_to_ptr.vmem [resolvable:$true] %s197_s12 }
  0x15   : > { %p551_p1 = scmp.ge.s32.totalorder %s754_s20, 1  ;;  %s184_s14 = scalar_lea.sflag [#allocation3], %s183_s5 }
  0x16   : > { %s756_s21 = smov 256   ;;  %s757_s22 = smov 16  }
  0x17   : > { %573 = dma.hbm_to_vmem [thread:$0]  (!%p571_p0), %s196_s13, 1024, %s198_s12, %s184_s14, %s756_s21, %s756_s21, %s757_s22  }
  0x18   : > { %p205_p2 = scmp.lt.s32.totalorder %s754_s20, 3 }
  0x1a   : > { %p206_p3 = pnand %p551_p1, %p205_p2 }
  0x1b   : > { %s860_s24 = sand.u32 (!%p206_p3), 1, %s738_s16  }
  0x1c   : > { %209 = sbr.rel (%p206_p3) target bundleno = 207 (0xcf), region = 32  ;;  %s552_s26 = sshll.u32 (!%p206_p3), %s860_s24, 6 }
  0x1d   : > { %s212_s6 = scalar_lea.sflag (!%p206_p3), [#allocation3], %s860_s24  ;;  %s215_s7 = scalar_lea.vmem (!%p206_p3), [#allocation2], %s552_s26 }
  0x21   : > { %725 = dma.done.wait (%p833_p8), %s212_s6, 1024  }
  0x22   : > { %727 = vsyncadd (%p833_p8), %s212_s6, 4294966272  ;;  %v758_v0 = vmov 0   ;;  %v269_v1 = vld [vmem:[%s215_s7 + $0x30] sm:$0xff]  ;;  %v270_v2 = vld [vmem:[%s215_s7 + $0x38] sm:$0xff]  ;;  %vm277_vm0 = vcmask 261120   ;;  %v365_v22 = vlaneseq  ;;  %p253_p4 = scmp.lt.s32.totalorder %s746_s18, 1 }
  0x23   : > { %633 = vset.pattern.permute.xlu0 %v758_v0  ;;  %v267_v3 = vld [vmem:[%s215_s7 + $0x20] sm:$0xff]  ;;  %293 = vmatpush.msra.mxu0 %v269_v1  ;;  %v268_v4 = vld [vmem:[%s215_s7 + $0x28] sm:$0xff]  ;;  %v265_v5 = vld [vmem:[%s215_s7 + $0x10] sm:$0xff]  ;;  %s553_s9 = sshll.u32 %s860_s24, 1  ;;  %v759_v31 = vmov 512.0   ;;  %s561_s10 = sshll.u32 %s746_s18, 1 }
  0x24   : > { %313 = vmatpush.msra.mxu1 %v270_v2  ;;  %v266_v6 = vld [vmem:[%s215_s7 + $0x18] sm:$0xff]  ;;  %v271_v7 = vld [vmem:[%s928_s2] sm:$0x3f]  ;;  %v264_v9 = vld [vmem:[%s215_s7 + $0x8] sm:$0xff]  ;;  %v371_v23 = vshrl.u32 %v365_v22, 7  ;;  %s943_s18 = smov (!%p253_p4, %s746_s18), 1  ;;  %s415_s13 = scalar_lea.hbm %s929_s3, %s561_s10 }
  0x25   : > { %294 = vmatpush.msra.mxu0 %v267_v3  ;;  %v263_v8 = vld [vmem:[%s215_s7] sm:$0xff]  ;;  %274 = vperm.xlu0 %633, %v271_v7   ;;  %v760_v38 = vmov 0.0   ;;  %s238_s14 = scalar_lea.vmem [#allocation5], %s553_s9  ;;  %s419_s22 = sshll.u32 %s415_s13, 4  ;;  %vm362_vm10 = vcmask 1040384   ;;  %vm367_vm11 = vcmp.lt.s32.totalorder %v365_v22, 256  ;;  %s420_s22 = int_to_ptr.hbm [resolvable:$true] %s419_s22 }
  0x26   : > { %314 = vmatpush.msra.mxu1 %v268_v4  ;;  %v262_v10 = vld [vmem:[%s927_s1] sm:$0x3f]  ;;  %vm372_vm1 = vcmp.eq.s32.totalorder %v371_v23, 4  ;;  %s417_s21 = sshll.u32 %s238_s14, 4  ;;  %s565_s26 = sshll.u32 %s943_s18, 4  ;;  %s418_s21 = int_to_ptr.vmem [resolvable:$true] %s417_s21 }
  0x27   : > { %295 = vmatpush.msra.mxu0 %v265_v5  ;;  %v373_v32 = vsel %vm372_vm1, 3.1415927, %v759_v31  ;;  %v374_v39 = vsel %vm372_vm1, -1.5707964, %v760_v38  ;;  %s260_s25 = scalar_lea.vmem %s930_s4, %s565_s26  ;;  %s394_s18 = scalar_lea.sflag [#allocation4], %s860_s24 }
  0x28   : > { %315 = vmatpush.msra.mxu1 %v266_v6  ;;  %v376_v41 = vrot.slane %v373_v32, 7  ;;  %v381_v46 = vrot.slane %v374_v39, 7  ;;  %s686_s5 = sshra.s32 %s420_s22, 4  ;;  %s692_s10 = scalar_lea.hbm %s929_s3, 4  ;;  %s687_s5 = int_to_ptr.hbm [resolvable:$true] %s686_s5 }
  0x29   : > { %296 = vmatpush.msra.mxu0 %v263_v8  ;;  %s688_s27 = scalar_lea.hbm %s687_s5, 2  ;;  %p693_p8 = scmp.lt.s32.totalorder %s687_s5, %s929_s3 }
  0x2a   : > { %316 = vmatpush.msra.mxu1 %v264_v9  ;;  %556 = vmatmul.msk.f32.vlgmr.msra.gmra.mxu0 %vm277_vm0, %v262_v10  ;;  %p689_p5 = scmp.ne.s32.totalorder %s687_s5, %s688_s27  ;;  %p694_p10 = scmp.lt.s32.totalorder %s692_s10, %s688_s27 }
  0x2b   : > { %557 = vmatmul.msk.f32.vlgmr.msra.gmra.mxu1 %vm277_vm0, %v262_v10 }
  0x2c   : > { %p690_p6 = pnand %p689_p5, %p837_p9  ;;  %p695_p13 = por %p694_p10, %p693_p8 }
  0x2e   : > { %p691_p7 = pneg %p690_p6 }
  0x30   : > { %p696_p0 = pnand %p695_p13, %p691_p7 }
  0x97   : > { %v275_v11 = vpop.permute.xlu0 %274 }
  0xa7   : > { %v298_v12 = vpop.f32.mrf.mxu0 }
  0xa8   : > { %v318_v13 = vpop.f32.mrf.mxu1  ;;  %v299_v14 = vadd.f32 %v298_v12, %v275_v11 }
  0xa9   : > { %v319_v15 = vadd.f32 %v318_v13, %v275_v11 }
  0xaa   : > { %v558_v16 = vmul.f32 -1.442695, %v299_v14 }
  0xab   : > { %v559_v17 = vmul.f32 -1.442695, %v319_v15 }
  0xac   : > { %634 = vpow2.f32 %v558_v16 }
  0xad   : > { %636 = vpow2.f32 %v559_v17 }
  0xb2   : > { %v635_v18 = vpop.eup %634 }
  0xb3   : > { %v637_v19 = vpop.eup %636  ;;  %v327_v20 = vadd.f32 1.0, %v635_v18 }
  0xb4   : > { %v328_v21 = vadd.f32 1.0, %v637_v19 }
  0xb5   : > { %638 = vrcp.f32 %v327_v20  ;;  %v340_v29 = vand.u32 2147483648, %v327_v20  ;;  %v338_v35 = vand.u32 2147483647, %v327_v20  ;;  %vm334_vm4 = vweird.f32 %v327_v20 }
  0xb6   : > { %640 = vrcp.f32 %v328_v21  ;;  %v355_v34 = vand.u32 2147483648, %v328_v21  ;;  %v353_v37 = vand.u32 2147483647, %v328_v21  ;;  %vm349_vm5 = vweird.f32 %v328_v21 }
  0xb7   : > { %v341_v42 = vor.u32 1.1754944e-38, %v340_v29  ;;  %vm339_vm8 = vcmp.eq.f32.partialorder %v338_v35, 8.507059e+37 }
  0xb8   : > { %v356_v44 = vor.u32 1.1754944e-38, %v355_v34  ;;  %vm354_vm9 = vcmp.eq.f32.partialorder %v353_v37, 8.507059e+37 }
  0xbb   : > { %v639_v24 = vpop.eup %638 }
  0xbc   : > { %v641_v25 = vpop.eup %640  ;;  %v330_v26 = vmul.f32 %v639_v24, %v327_v20  ;;  %vm335_vm2 = vweird.f32 %v639_v24 }
  0xbd   : > { %v345_v27 = vmul.f32 %v641_v25, %v328_v21  ;;  %vm350_vm3 = vweird.f32 %v641_v25  ;;  %vm336_vm6 = vmor %vm334_vm4, %vm335_vm2 }
  0xbe   : > { %v331_v28 = vsub.f32 1.0, %v330_v26  ;;  %vm351_vm7 = vmor %vm349_vm5, %vm350_vm3 }
  0xbf   : > { %v346_v30 = vsub.f32 1.0, %v345_v27 }
  0xc0   : > { %v332_v33 = vmul.f32 %v639_v24, %v331_v28 }
  0xc1   : > { %v347_v36 = vmul.f32 %v641_v25, %v346_v30 }
  0xc2   : > { %v333_v40 = vadd.f32 %v639_v24, %v332_v33 }
  0xc3   : > { %v348_v43 = vadd.f32 %v641_v25, %v347_v36 }
  0xc4   : > { %v337_v45 = vsel %vm336_vm6, %v639_v24, %v333_v40 }
  0xc5   : > { %v342_v47 = vsel %vm339_vm8, %v341_v42, %v337_v45  ;;  %v352_v48 = vsel %vm351_vm7, %v641_v25, %v348_v43 }
  0xc6   : > { %v357_v49 = vsel %vm354_vm9, %v356_v44, %v352_v48  ;;  %v378_v50 = vmul.f32 %v376_v41, %v342_v47 }
  0xc7   : > { %v361_v51 = vrot.slane %v357_v49, 7  ;;  %v379_v52 = vmul.f32 %v376_v41, %v357_v49 }
  0xc8   : > { %v383_v53 = vadd.f32 %v381_v46, %v378_v50 }
  0xc9   : > { %v363_v54 = vsel %vm362_vm10, %v342_v47, %v361_v51  ;;  %v384_v55 = vadd.f32 %v381_v46, %v379_v52 }
  0xca   : > { %369 = vst.msk [vmem:[%s238_s14] sm:$0x3] %vm367_vm11, %v363_v54  ;;  %v387_v56 = vrot.slane %v383_v53, 1 }
  0xcb   : > { %v388_v57 = vrot.slane %v384_v55, 1 }
  0xcc   : > { %699 = shalt.err (!%p696_p0)
}
  0xcd   : > { %568 = dma.vmem_to_hbm [thread:$0]  (%p837_p9), %s418_s21, 32, %s420_s22, %s394_s18   ;;  %391 = vst [vmem:[%s260_s25] sm:$0x1f] %v387_v56 }
  0xce   : > { %392 = vst [vmem:[%s260_s25 + $0x8] sm:$0x1f] %v388_v57 }
  0xcf PF: > { %s435_s24 = sand.u32 1, %s734_s15   ;;  %p575_p1 = pnand %p547_p12, %p844_p11 }
  0xd0   : > { %s436_s13 = scalar_lea.sflag [#allocation4], %s435_s24 }
  0xd1   : > { %p576_p2 = pneg %p575_p1 }
  0xd3   : > { %729 = dma.done.wait (%p576_p2), %s436_s13, 32  }
  0xd4   : > { %731 = vsyncadd (%p576_p2), %s436_s13, 4294967264  ;;  %s21_s20 = sadd.s32 1, %s754_s20   ;;  %s935_s15 = smov %s738_s16 }
  0xd5   : > { %p18_p3 = scmp.ge.s32.totalorder %s21_s20, 4   ;;  %s936_s16 = smov %s742_s17 }
  0xd6   : > { %s937_s17 = smov %s842_s29  ;;  %s938_s18 = smov %s750_s19 }
  0xd7   : > { %s939_s19 = smov %s941_s23  ;;  %20 = sbr.rel (!%p18_p3) target bundleno = 6 (0x6), region = 89 }
  0xdc   :  { %454 = vsyncpa [#allocation3], 1 }
  0xdd   :  { %456 = vsyncpa [#allocation3 + $0x1], 1 }
  0xde   :  { %457 = vsyncpa [#allocation4], 1 }
  0xdf   :  { %459 = vsyncpa [#allocation4 + $0x1], 1 }

</bundles_post_ra>
